<compile_context>
chip_gen: v7x
topology: tpu7x:2x2x1
jax: 0.10.0
libtpu: 0.0.40
codegen_flags: <defaults>
</compile_context>

<pallas_src>
import jax
import jax.numpy as jnp
from jax.experimental import pallas as pl
from jax.experimental.pallas import tpu as pltpu


def _hyperlinear_kernel(x_ref, ntile_ref, w_ref, sel_ref, out_ref, acc_ref):
    """One (batch-tile i, H-tile j) grid step.

    x_ref     : (TB, TH)      bf16  pre-scaled activations ([posterior ; prior] along H)
    ntile_ref : (TB, A*K')    f32   tiled processed noise (+ trailing 1 for the bias column)
    w_ref     : (TH, A*K')    bf16  re-associated hypernet weights+bias, lane-dense in A*K'
    sel_ref   : (A*K', A)     f32   0/1 group-sum selection matrix
    out_ref   : (TB, A)       f32   final output block (written on the last H tile)
    acc_ref   : (TB, A*K')    f32   VMEM accumulator, resident across the H (reduction) axis
    """
    j = pl.program_id(1)

    @pl.when(j == 0)
    def _init():
        acc_ref[...] = jnp.zeros_like(acc_ref)

    # Single MXU matmul per step: contraction over the H tile (depth TH), lane-dense N = A*K'.
    acc_ref[...] += jnp.dot(x_ref[...], w_ref[...], preferred_element_type=jnp.float32)

    @pl.when(j == pl.num_programs(1) - 1)
    def _finalize():
        # Per-sample noise contraction: one VPU multiply + one tiny grouped-sum matmul.
        prod = acc_ref[...] * ntile_ref[...]
        out_ref[...] = jnp.dot(prod, sel_ref[...],
                               preferred_element_type=jnp.float32).astype(out_ref.dtype)


def _round_up(v, m):
    return (v + m - 1) // m * m


def _choose_h_tiling(h_eff, block_h=None):
    """Pick the H (reduction) tile.  Per-step working set is tiny, so prefer one big block;
    fall back to 1024-wide lane-aligned tiles (with zero padding) for very large H."""
    if block_h is not None:
        th = max(128, _round_up(block_h, 128))
        if th >= h_eff:
            return h_eff, h_eff
        return th, _round_up(h_eff, th)
    if h_eff <= 2048:
        return h_eff, h_eff
    th = 1024
    return th, _round_up(h_eff, th)


def _pick_batch_tile(B, batch_block=128):
    tb = _round_up(B, 8)
    if B >= 16:
        # Keep >=2 blocks on the "parallel" batch axis so both v7x TensorCores get work.
        tb = min(tb, _round_up((B + 1) // 2, 8))
    return min(tb, batch_block)


def init_params(key, in_features, out_features, noise_dim, prior_std=1.0):
    """Synthetic init matching the torch parameter shapes (HyperLayer weight (H*A, K), bias (H*A,))."""
    H, A, K = in_features, out_features, noise_dim
    HA = H * A
    k1, k2, k3, k4 = jax.random.split(key, 4)
    xavier_std = (2.0 / (K + HA)) ** 0.5
    hyper_w = xavier_std * jax.random.normal(k1, (HA, K), jnp.float32)
    bound = 1.0 / (K ** 0.5)
    hyper_b = jax.random.uniform(k2, (HA,), jnp.float32, -bound, bound)
    kaiming_bound = (6.0 / (6.0 * K)) ** 0.5          # kaiming_uniform-like (prior_init fallback)
    prior_w = prior_std * jax.random.uniform(k3, (HA, K), jnp.float32, -kaiming_bound, kaiming_bound)
    prior_b = jax.random.uniform(k4, (HA,), jnp.float32, -bound, bound)
    return dict(hyper_w=hyper_w, hyper_b=hyper_b, prior_w=prior_w, prior_b=prior_b)


def prepare_params(params, in_features, out_features, *, prior_std=1.0, weight_dtype=jnp.bfloat16):
    """One-time re-layout of torch-style HyperLinear params into the re-associated kernel layout.

    torch layout : W (H*A, K) with row index h*A+a ;  b (H*A,)
    kernel layout: W_r (H, A*(K+1)) with W_r[h, a*(K+1)+k] = W[h*A+a, k] and the (K+1)-th column
                   of each group = b[h*A+a].  Posterior and prior are concatenated along H so both
                   are contracted in one pass.
    """
    H, A = in_features, out_features
    K = params['hyper_w'].shape[1]
    k_aug = K + 1

    def relayout(w, b):
        w3 = w.reshape(H, A, K)                             # w3[h,a,k] = W[h*A+a, k]
        b3 = b.reshape(H, A, 1)                             # b3[h,a,0] = b[h*A+a]
        return jnp.concatenate([w3, b3], axis=2).reshape(H, A * k_aug)

    w_post = relayout(params['hyper_w'], params['hyper_b'])
    has_prior = (prior_std > 0) and ('prior_w' in params)
    if has_prior:
        w_prior = relayout(params['prior_w'], params['prior_b'])
        w_all = jnp.concatenate([w_post, w_prior], axis=0)  # (2H, A*k_aug)
    else:
        w_all = w_post

    # 0/1 group-sum selection matrix: sel[a*k_aug + k, a] = 1.
    sel = jnp.repeat(jnp.eye(A, dtype=jnp.float32), k_aug, axis=0)

    return dict(
        w_all=w_all.astype(weight_dtype),
        w_post=w_post.astype(weight_dtype),
        sel=sel, k_aug=k_aug, noise_dim=K, has_prior=has_prior,
    )


def hyperlinear_forward(kparams, x, prior_x, noise, *, in_features, out_features,
                        posterior_scale=1.0, prior_scale=1.0,
                        noise_norm=0, noise_scale=0,
                        block_h=None, batch_block=128,
                        activation_dtype=jnp.bfloat16):
    """HyperLinear.forward. Returns (B, 1, out_features)."""
    del in_features  # H is taken from x; kept for interface parity with the torch module.
    B = x.shape[0]
    A = out_features
    K = kparams['noise_dim']
    k_aug = kparams['k_aug']
    N = A * k_aug

    # process_noise (tiny elementwise op, stays in plain JAX).
    noise = noise.astype(jnp.float32)
    if noise_norm:
        noise = noise / jnp.linalg.norm(noise, axis=-1, keepdims=True)
    elif noise_scale:
        noise = noise / jnp.sqrt(jnp.asarray(K, jnp.float32))

    use_prior = (prior_x is not None) and kparams['has_prior']
    if use_prior:
        # Fold the output scales into the activations; one fused pass over [posterior ; prior].
        x_all = jnp.concatenate(
            [posterior_scale * x.astype(jnp.float32),
             prior_scale * prior_x.astype(jnp.float32)], axis=1)
        w_all = kparams['w_all']
    else:
        # torch applies no scaling in the posterior-only branch; prior work is skipped entirely.
        x_all = x.astype(jnp.float32)
        w_all = kparams['w_post']

    # Activations only feed the MXU -> bf16 halves the dominant per-step read (f32 accumulation).
    x_all = x_all.astype(activation_dtype)
    h_eff = x_all.shape[1]

    # Tiled noise so that ntile[b, a*k_aug + k] = noise_aug[b, k]; the bias column gets a 1.
    noise_aug = jnp.concatenate([noise, jnp.ones((B, 1), jnp.float32)], axis=1)
    noise_tiled = jnp.tile(noise_aug, (1, A))               # (B, N) f32
    sel = kparams['sel']

    # --- tiling ---
    th, h_pad = _choose_h_tiling(h_eff, block_h)
    if h_pad != h_eff:
        # TODO(synk): pre-pad w_all at init time so large-H calls avoid this per-call pad.
        x_all = jnp.pad(x_all, ((0, 0), (0, h_pad - h_eff)))
        w_all = jnp.pad(w_all, ((0, h_pad - h_eff), (0, 0)))

    tb = _pick_batch_tile(B, batch_block)
    b_pad = _round_up(B, tb)
    if b_pad != B:
        x_all = jnp.pad(x_all, ((0, b_pad - B), (0, 0)))
        noise_tiled = jnp.pad(noise_tiled, ((0, b_pad - B), (0, 0)))

    grid = (b_pad // tb, h_pad // th)

    x_item = jnp.dtype(activation_dtype).itemsize
    w_item = w_all.dtype.itemsize

    # Explicit VMEM budget: real working set is tiny; keep well under v7x's 64 MiB physical VMEM.
    blk_bytes = (2 * (tb * th * x_item + th * N * w_item)    # double-buffered x / w streams
                 + 2 * tb * N * 4 + 2 * N * A * 4            # noise tile + selection matrix
                 + tb * N * 4 + 2 * tb * A * 4)              # accumulator + output
    vmem_limit = int(min(24 << 20, max(4 << 20, 4 * blk_bytes)))

    # Advisory cost: the weight stream is re-read once per batch tile (w index_map ignores i).
    flops = 2 * b_pad * h_pad * N + 2 * b_pad * N * A + b_pad * N
    bytes_accessed = (grid[0] * h_pad * N * w_item
                      + b_pad * h_pad * x_item
                      + b_pad * N * 4 + N * A * 4 + b_pad * A * 4)

    out = pl.pallas_call(
        _hyperlinear_kernel,
        out_shape=jax.ShapeDtypeStruct((b_pad, A), jnp.float32),
        grid_spec=pltpu.PrefetchScalarGridSpec(
            num_scalar_prefetch=0,
            grid=grid,
            in_specs=[
                pl.BlockSpec((tb, th), lambda i, j: (i, j)),     # pre-scaled activations
                pl.BlockSpec((tb, N), lambda i, j: (i, 0)),      # tiled noise (+ bias ones)
                pl.BlockSpec((th, N), lambda i, j: (j, 0)),      # weights+bias, lane-dense in N
                pl.BlockSpec((N, A), lambda i, j: (0, 0)),       # group-sum selection matrix
            ],
            out_specs=pl.BlockSpec((tb, A), lambda i, j: (i, 0)),
            scratch_shapes=[pltpu.VMEM((tb, N), jnp.float32)],
        ),
        compiler_params=pltpu.CompilerParams(
            dimension_semantics=("parallel", "arbitrary"),
            vmem_limit_bytes=vmem_limit),
        cost_estimate=pl.CostEstimate(flops=int(flops), transcendentals=0,
                                      bytes_accessed=int(bytes_accessed)),
    )(x_all, noise_tiled, w_all, sel)

    # torch einsum 'bh,bnha->bna' keeps the n=1 axis.
    return out[:B].reshape(B, 1, A)


if __name__ == "__main__":
    B, H, A, K = 4, 256, 8, 16      # batch, in_features, out_features (action dim), noise_dim
    posterior_scale, prior_scale, prior_std = 1.0, 1.0, 1.0

    key = jax.random.PRNGKey(0)
    kp, kx, kpx, kn, kx2, kpx2, kn2 = jax.random.split(key, 7)
    params = init_params(kp, H, A, K, prior_std=prior_std)
    kparams = prepare_params(params, H, A, prior_std=prior_std, weight_dtype=jnp.bfloat16)

    x = jax.random.normal(kx, (B, H), jnp.float32)
    prior_x = jax.random.normal(kpx, (B, H), jnp.float32)
    noise = jax.random.normal(kn, (B, K), jnp.float32)

    out = hyperlinear_forward(kparams, x, prior_x, noise,
                              in_features=H, out_features=A,
                              posterior_scale=posterior_scale, prior_scale=prior_scale)
    out = jax.block_until_ready(out)

    # Pure-JAX reference of the torch forward, using the same bf16-quantized params/activations.
    bf = lambda t: t.astype(jnp.bfloat16).astype(jnp.float32)
    gw = (noise @ bf(params['hyper_w']).T + bf(params['hyper_b'])).reshape(B, H, A)
    pw = (noise @ bf(params['prior_w']).T + bf(params['prior_b'])).reshape(B, H, A)
    ref = (posterior_scale * jnp.einsum('bh,bha->ba', bf(x), gw)
           + prior_scale * jnp.einsum('bh,bha->ba', bf(prior_x), pw)).reshape(B, 1, A)
    assert out.shape == (B, 1, A), out.shape
    assert jnp.allclose(out, ref, rtol=2e-2, atol=2e-2), (out, ref)

    # Posterior-only branch (prior path skipped entirely) + explicit multi-H-tile reduction grid.
    out_post = jax.block_until_ready(
        hyperlinear_forward(kparams, x, None, noise, in_features=H, out_features=A, block_h=128))
    ref_post = jnp.einsum('bh,bha->ba', bf(x), gw).reshape(B, 1, A)
    assert out_post.shape == (B, 1, A)
    assert jnp.allclose(out_post, ref_post, rtol=2e-2, atol=2e-2), (out_post, ref_post)

    # Larger batch: exercises batch padding + >=2 "parallel" batch tiles + non-unit scales.
    B2 = 24
    x2 = jax.random.normal(kx2, (B2, H), jnp.float32)
    prior_x2 = jax.random.normal(kpx2, (B2, H), jnp.float32)
    noise2 = jax.random.normal(kn2, (B2, K), jnp.float32)
    out2 = jax.block_until_ready(
        hyperlinear_forward(kparams, x2, prior_x2, noise2, in_features=H, out_features=A,
                            posterior_scale=0.5, prior_scale=2.0))
    gw2 = (noise2 @ bf(params['hyper_w']).T + bf(params['hyper_b'])).reshape(B2, H, A)
    pw2 = (noise2 @ bf(params['prior_w']).T + bf(params['prior_b'])).reshape(B2, H, A)
    ref2 = (0.5 * jnp.einsum('bh,bha->ba', bf(x2), gw2)
            + 2.0 * jnp.einsum('bh,bha->ba', bf(prior_x2), pw2)).reshape(B2, 1, A)
    assert out2.shape == (B2, 1, A)
    assert jnp.allclose(out2, ref2, rtol=2e-2, atol=2e-2), (out2, ref2)

    print("KERNEL_OK")
</pallas_src>

<mosaic_0001>
module attributes {stable_mosaic.version = 11 : i64} {
  func.func @_hyperlinear_kernel(%arg0: i32, %arg1: i32, %arg2: memref<8x512xbf16, #tpu.memory_space<vmem>>, %arg3: memref<8x136xf32, #tpu.memory_space<vmem>>, %arg4: memref<512x136xbf16, #tpu.memory_space<vmem>>, %arg5: memref<136x8xf32, #tpu.memory_space<vmem>>, %arg6: memref<8x8xf32, #tpu.memory_space<vmem>>, %arg7: memref<8x136xf32, #tpu.memory_space<vmem>>) attributes {dimension_semantics = [#tpu.dimension_semantics<parallel>, #tpu.dimension_semantics<arbitrary>], iteration_bounds = array<i64: 1, 1>, scalar_prefetch = 0 : i64, scratch_operands = 1 : i64, tpu.core_type = #tpu.core_type<tc>, window_params = [{transform_indices = @transform_0, window_bounds = array<i64: 8, 512>}, {transform_indices = @transform_1, window_bounds = array<i64: 8, 136>}, {transform_indices = @transform_2, window_bounds = array<i64: 512, 136>}, {pipeline_mode = #tpu.pipeline_mode<synchronous>, transform_indices = @transform_3, window_bounds = array<i64: 136, 8>}, {transform_indices = @transform_4, window_bounds = array<i64: 8, 8>}]} {
    %c0_i32 = arith.constant 0 : i32
    %0 = arith.cmpi eq, %arg1, %c0_i32 : i32
    %1 = arith.extui %0 : i1 to i32
    %c0_i32_0 = arith.constant 0 : i32
    %2 = arith.cmpi ne, %1, %c0_i32_0 : i32
    scf.if %2 {
      %cst_10 = arith.constant 0.000000e+00 : f32
      %12 = vector.broadcast %cst_10 : f32 to vector<8x136xf32>
      %c0_11 = arith.constant 0 : index
      %c0_12 = arith.constant 0 : index
      %13 = vector.load %arg7[%c0_11, %c0_12] : memref<8x136xf32, #tpu.memory_space<vmem>>, vector<8x136xf32>
      tpu.vector_store %arg7[%c0_11, %c0_12], %12 {strides = array<i32>} : memref<8x136xf32, #tpu.memory_space<vmem>>, vector<8x136xf32>,
    } else {
    }
    %c0 = arith.constant 0 : index
    %c0_1 = arith.constant 0 : index
    %3 = vector.load %arg7[%c0, %c0_1] : memref<8x136xf32, #tpu.memory_space<vmem>>, vector<8x136xf32>
    %c0_2 = arith.constant 0 : index
    %c0_3 = arith.constant 0 : index
    %4 = vector.load %arg2[%c0_2, %c0_3] : memref<8x512xbf16, #tpu.memory_space<vmem>>, vector<8x512xbf16>
    %c0_4 = arith.constant 0 : index
    %c0_5 = arith.constant 0 : index
    %5 = vector.load %arg4[%c0_4, %c0_5] : memref<512x136xbf16, #tpu.memory_space<vmem>>, vector<512x136xbf16>
    %cst = arith.constant dense<0.000000e+00> : vector<8x136xf32>
    %6 = tpu.matmul %4, %5, %cst {dimension_numbers = #tpu.dot_dimension_numbers<[1], [0], [0], [1], [0, 0, 1, 1], [], []>} : vector<8x512xbf16>, vector<512x136xbf16>, vector<8x136xf32> -> vector<8x136xf32>
    %7 = arith.addf %3, %6 : vector<8x136xf32>
    %c0_6 = arith.constant 0 : index
    %c0_7 = arith.constant 0 : index
    %8 = vector.load %arg7[%c0_6, %c0_7] : memref<8x136xf32, #tpu.memory_space<vmem>>, vector<8x136xf32>
    tpu.vector_store %arg7[%c0_6, %c0_7], %7 {strides = array<i32>} : memref<8x136xf32, #tpu.memory_space<vmem>>, vector<8x136xf32>,
    %c0_i32_8 = arith.constant 0 : i32
    %9 = arith.cmpi eq, %arg1, %c0_i32_8 : i32
    %10 = arith.extui %9 : i1 to i32
    %c0_i32_9 = arith.constant 0 : i32
    %11 = arith.cmpi ne, %10, %c0_i32_9 : i32
    scf.if %11 {
      %c0_10 = arith.constant 0 : index
      %c0_11 = arith.constant 0 : index
      %12 = vector.load %arg7[%c0_10, %c0_11] : memref<8x136xf32, #tpu.memory_space<vmem>>, vector<8x136xf32>
      %c0_12 = arith.constant 0 : index
      %c0_13 = arith.constant 0 : index
      %13 = vector.load %arg3[%c0_12, %c0_13] : memref<8x136xf32, #tpu.memory_space<vmem>>, vector<8x136xf32>
      %14 = arith.mulf %12, %13 : vector<8x136xf32>
      %c0_14 = arith.constant 0 : index
      %c0_15 = arith.constant 0 : index
      %15 = vector.load %arg5[%c0_14, %c0_15] : memref<136x8xf32, #tpu.memory_space<vmem>>, vector<136x8xf32>
      %cst_16 = arith.constant dense<0.000000e+00> : vector<8x8xf32>
      %16 = tpu.matmul %14, %15, %cst_16 {dimension_numbers = #tpu.dot_dimension_numbers<[1], [0], [0], [1], [0, 0, 1, 1], [], []>} : vector<8x136xf32>, vector<136x8xf32>, vector<8x8xf32> -> vector<8x8xf32>
      %c0_17 = arith.constant 0 : index
      %c0_18 = arith.constant 0 : index
      %17 = vector.load %arg6[%c0_17, %c0_18] : memref<8x8xf32, #tpu.memory_space<vmem>>, vector<8x8xf32>
      tpu.vector_store %arg6[%c0_17, %c0_18], %16 {strides = array<i32>} : memref<8x8xf32, #tpu.memory_space<vmem>>, vector<8x8xf32>,
    } else {
    }
    return
  }
  func.func @transform_0(%arg0: i32, %arg1: i32) -> (i32, i32) {
    %c0_i32 = arith.constant 0 : i32
    return %arg0, %arg1 : i32, i32
  }
  func.func @transform_1(%arg0: i32, %arg1: i32) -> (i32, i32) {
    %c0_i32 = arith.constant 0 : i32
    %c0_i32_0 = arith.constant 0 : i32
    return %arg0, %c0_i32 : i32, i32
  }
  func.func @transform_2(%arg0: i32, %arg1: i32) -> (i32, i32) {
    %c0_i32 = arith.constant 0 : i32
    %c0_i32_0 = arith.constant 0 : i32
    return %arg1, %c0_i32 : i32, i32
  }
  func.func @transform_3(%arg0: i32, %arg1: i32) -> (i32, i32) {
    %c0_i32 = arith.constant 0 : i32
    %c0_i32_0 = arith.constant 0 : i32
    %c0_i32_1 = arith.constant 0 : i32
    return %c0_i32, %c0_i32_0 : i32, i32
  }
  func.func @transform_4(%arg0: i32, %arg1: i32) -> (i32, i32) {
    %c0_i32 = arith.constant 0 : i32
    %c0_i32_0 = arith.constant 0 : i32
    return %arg0, %c0_i32 : i32, i32
  }
}

</mosaic_0001>

<bundles_post_ra>
// kernel: tpu_custom_call.1
= control target key start
LH: loop header
LB: loop body
LE: loop exit
PB: predicated region body
PF: predicated region fallthrough
CT: control target
= control target key end

     0   :  { %s1147_s0 = inlined_call_operand.vmem [shape: bf16[8,512], index: 0, kind: input, shape index: {}]   ;;  %s1148_s1 = inlined_call_operand.vmem [shape: f32[8,136], index: 1, kind: input, shape index: {}]   ;;  %s1149_s2 = inlined_call_operand.vmem [shape: bf16[512,136], index: 2, kind: input, shape index: {}]   ;;  %s1150_s3 = inlined_call_operand.vmem [shape: f32[136,8], index: 3, kind: input, shape index: {}]   ;;  %s1151_s4 = inlined_call_operand.hbm [shape: f32[8,8], index: 4, kind: output, shape index: {}]  }
   0x1   :  { %v724_v0 = vld [vmem:[%s1149_s2 + $0x4] ss:$8 sps:$4 sm:$0xff]   ;;  %v728_v2 = vld [vmem:[%s1149_s2] ss:$8 sps:$4 sm:$0xff]   ;;  %v730_v4 = vld [vmem:[%s1149_s2 + $0x14] ss:$8 sps:$4 sm:$0xff]  }
   0x2   :  { %v726_v1 = vld [vmem:[%s1149_s2 + $0x104] ss:$8 sps:$4 sm:$0xff]   ;;  %427 = vmatprep.subr.bf16.mxu0 %v724_v0  ;;  %v729_v3 = vld [vmem:[%s1149_s2 + $0x100] ss:$8 sps:$4 sm:$0xff]   ;;  %v732_v5 = vld [vmem:[%s1149_s2 + $0x114] ss:$8 sps:$4 sm:$0xff]  }
   0x3   :  { %468 = vmatprep.subr.bf16.mxu1 %v726_v1  ;;  %428 = vmatpush1.bf16.msra.mxu0 %v728_v2  ;;  %v734_v6 = vld [vmem:[%s1149_s2 + $0x10] ss:$8 sps:$4 sm:$0xff]   ;;  %v736_v8 = vld [vmem:[%s1149_s2 + $0x24] ss:$8 sps:$4 sm:$0xff]   ;;  %v740_v10 = vld [vmem:[%s1149_s2 + $0x20] ss:$8 sps:$4 sm:$0xff]  }
   0x4   :  { %469 = vmatpush1.bf16.msra.mxu1 %v729_v3  ;;  %429 = vmatprep.subr.bf16.mxu0 %v730_v4  ;;  %v735_v7 = vld [vmem:[%s1149_s2 + $0x110] ss:$8 sps:$4 sm:$0xff]   ;;  %v738_v9 = vld [vmem:[%s1149_s2 + $0x124] ss:$8 sps:$4 sm:$0xff]   ;;  %v741_v11 = vld [vmem:[%s1149_s2 + $0x120] ss:$8 sps:$4 sm:$0xff]  }
   0x5   :  { %470 = vmatprep.subr.bf16.mxu1 %v732_v5  ;;  %v742_v12 = vld [vmem:[%s1149_s2 + $0x34] ss:$8 sps:$4 sm:$0xff]   ;;  %v746_v14 = vld [vmem:[%s1149_s2 + $0x30] ss:$8 sps:$4 sm:$0xff]   ;;  %v748_v16 = vld [vmem:[%s1149_s2 + $0x44] ss:$8 sps:$4 sm:$0xff]  }
   0x6   :  { %v744_v13 = vld [vmem:[%s1149_s2 + $0x134] ss:$8 sps:$4 sm:$0xff]   ;;  %v747_v15 = vld [vmem:[%s1149_s2 + $0x130] ss:$8 sps:$4 sm:$0xff]   ;;  %v750_v17 = vld [vmem:[%s1149_s2 + $0x144] ss:$8 sps:$4 sm:$0xff]  }
   0x7   :  { %430 = vmatpush1.bf16.msra.mxu0 %v734_v6  ;;  %v752_v18 = vld [vmem:[%s1149_s2 + $0x40] ss:$8 sps:$4 sm:$0xff]   ;;  %v754_v20 = vld [vmem:[%s1149_s2 + $0x54] ss:$8 sps:$4 sm:$0xff]   ;;  %v758_v22 = vld [vmem:[%s1149_s2 + $0x50] ss:$8 sps:$4 sm:$0xff]  }
   0x8   :  { %471 = vmatpush1.bf16.msra.mxu1 %v735_v7  ;;  %431 = vmatprep.subr.bf16.mxu0 %v736_v8  ;;  %v753_v19 = vld [vmem:[%s1149_s2 + $0x140] ss:$8 sps:$4 sm:$0xff]   ;;  %v756_v21 = vld [vmem:[%s1149_s2 + $0x154] ss:$8 sps:$4 sm:$0xff]   ;;  %v759_v23 = vld [vmem:[%s1149_s2 + $0x150] ss:$8 sps:$4 sm:$0xff]  }
   0x9   :  { %472 = vmatprep.subr.bf16.mxu1 %v738_v9  ;;  %v760_v24 = vld [vmem:[%s1149_s2 + $0x64] ss:$8 sps:$4 sm:$0xff]   ;;  %v764_v26 = vld [vmem:[%s1149_s2 + $0x60] ss:$8 sps:$4 sm:$0xff]   ;;  %v766_v28 = vld [vmem:[%s1149_s2 + $0x74] ss:$8 sps:$4 sm:$0xff]  }
   0xa   :  { %v762_v25 = vld [vmem:[%s1149_s2 + $0x164] ss:$8 sps:$4 sm:$0xff]   ;;  %v765_v27 = vld [vmem:[%s1149_s2 + $0x160] ss:$8 sps:$4 sm:$0xff]   ;;  %v768_v29 = vld [vmem:[%s1149_s2 + $0x174] ss:$8 sps:$4 sm:$0xff]  }
   0xb   :  { %432 = vmatpush1.bf16.msra.mxu0 %v740_v10  ;;  %v770_v30 = vld [vmem:[%s1149_s2 + $0x70] ss:$8 sps:$4 sm:$0xff]   ;;  %v772_v32 = vld [vmem:[%s1149_s2 + $0x84] ss:$8 sps:$4 sm:$0xff]   ;;  %v776_v34 = vld [vmem:[%s1149_s2 + $0x80] ss:$8 sps:$4 sm:$0xff]  }
   0xc   :  { %473 = vmatpush1.bf16.msra.mxu1 %v741_v11  ;;  %433 = vmatprep.subr.bf16.mxu0 %v742_v12  ;;  %v771_v31 = vld [vmem:[%s1149_s2 + $0x170] ss:$8 sps:$4 sm:$0xff]   ;;  %v774_v33 = vld [vmem:[%s1149_s2 + $0x184] ss:$8 sps:$4 sm:$0xff]   ;;  %v777_v35 = vld [vmem:[%s1149_s2 + $0x180] ss:$8 sps:$4 sm:$0xff]  }
   0xd   :  { %474 = vmatprep.subr.bf16.mxu1 %v744_v13  ;;  %v778_v36 = vld [vmem:[%s1149_s2 + $0x94] ss:$8 sps:$4 sm:$0xff]   ;;  %v782_v38 = vld [vmem:[%s1149_s2 + $0x90] ss:$8 sps:$4 sm:$0xff]   ;;  %v784_v40 = vld [vmem:[%s1149_s2 + $0xa4] ss:$8 sps:$4 sm:$0xff]  }
   0xe   :  { %v780_v37 = vld [vmem:[%s1149_s2 + $0x194] ss:$8 sps:$4 sm:$0xff]   ;;  %v783_v39 = vld [vmem:[%s1149_s2 + $0x190] ss:$8 sps:$4 sm:$0xff]   ;;  %v786_v41 = vld [vmem:[%s1149_s2 + $0x1a4] ss:$8 sps:$4 sm:$0xff]  }
   0xf   :  { %434 = vmatpush1.bf16.msra.mxu0 %v746_v14  ;;  %v788_v42 = vld [vmem:[%s1149_s2 + $0xa0] ss:$8 sps:$4 sm:$0xff]   ;;  %v790_v44 = vld [vmem:[%s1149_s2 + $0xb4] ss:$8 sps:$4 sm:$0xff]   ;;  %v794_v49 = vld [vmem:[%s1149_s2 + $0xb0] ss:$8 sps:$4 sm:$0xff]  }
  0x10   :  { %475 = vmatpush1.bf16.msra.mxu1 %v747_v15  ;;  %435 = vmatprep.subr.bf16.mxu0 %v748_v16  ;;  %v789_v43 = vld [vmem:[%s1149_s2 + $0x1a0] ss:$8 sps:$4 sm:$0xff]   ;;  %v792_v45 = vld [vmem:[%s1149_s2 + $0x1b4] ss:$8 sps:$4 sm:$0xff]   ;;  %v795_v50 = vld [vmem:[%s1149_s2 + $0x1b0] ss:$8 sps:$4 sm:$0xff]  }
  0x11   :  { %476 = vmatprep.subr.bf16.mxu1 %v750_v17  ;;  %v27_v46 = vld [vmem:[%s1147_s0] sm:$0xff]  ;;  %v28_v48 = vld [vmem:[%s1147_s0 + $0x8] sm:$0xff] }
  0x12   :  { %v629_v47 = vcombine.high %v27_v46, %v27_v46  ;;  %v631_v51 = vcombine.high %v28_v48, %v28_v48  ;;  %v796_v52 = vld [vmem:[%s1149_s2 + $0xc4] ss:$8 sps:$4 sm:$0xff]  }
  0x13   :  { %436 = vmatpush1.bf16.msra.mxu0 %v752_v18  ;;  %v798_v53 = vld [vmem:[%s1149_s2 + $0x1c4] ss:$8 sps:$4 sm:$0xff]  }
  0x14   :  { %477 = vmatpush1.bf16.msra.mxu1 %v753_v19  ;;  %437 = vmatprep.subr.bf16.mxu0 %v754_v20 }
  0x15   :  { %478 = vmatprep.subr.bf16.mxu1 %v756_v21  ;;  %459 = vmatprep.mubr.bf16.mxu0 %v629_v47 }
  0x16   :  { %500 = vmatprep.mubr.bf16.mxu1 %v631_v51 }
  0x17   :  { %438 = vmatpush1.bf16.msra.mxu0 %v758_v22 }
  0x18   :  { %479 = vmatpush1.bf16.msra.mxu1 %v759_v23  ;;  %439 = vmatprep.subr.bf16.mxu0 %v760_v24 }
  0x19   :  { %480 = vmatprep.subr.bf16.mxu1 %v762_v25 }
  0x1b   :  { %440 = vmatpush1.bf16.msra.mxu0 %v764_v26 }
  0x1c   :  { %481 = vmatpush1.bf16.msra.mxu1 %v765_v27  ;;  %441 = vmatprep.subr.bf16.mxu0 %v766_v28 }
  0x1d   :  { %482 = vmatprep.subr.bf16.mxu1 %v768_v29 }
  0x1f   :  { %442 = vmatpush1.bf16.msra.mxu0 %v770_v30 }
  0x20   :  { %483 = vmatpush1.bf16.msra.mxu1 %v771_v31  ;;  %443 = vmatprep.subr.bf16.mxu0 %v772_v32 }
  0x21   :  { %484 = vmatprep.subr.bf16.mxu1 %v774_v33 }
  0x23   :  { %444 = vmatpush1.bf16.msra.mxu0 %v776_v34 }
  0x24   :  { %485 = vmatpush1.bf16.msra.mxu1 %v777_v35  ;;  %445 = vmatprep.subr.bf16.mxu0 %v778_v36 }
  0x25   :  { %486 = vmatprep.subr.bf16.mxu1 %v780_v37 }
  0x27   :  { %446 = vmatpush1.bf16.msra.mxu0 %v782_v38 }
  0x28   :  { %487 = vmatpush1.bf16.msra.mxu1 %v783_v39  ;;  %447 = vmatprep.subr.bf16.mxu0 %v784_v40 }
  0x29   :  { %488 = vmatprep.subr.bf16.mxu1 %v786_v41 }
  0x2b   :  { %448 = vmatpush1.bf16.msra.mxu0 %v788_v42 }
  0x2c   :  { %489 = vmatpush1.bf16.msra.mxu1 %v789_v43  ;;  %449 = vmatprep.subr.bf16.mxu0 %v790_v44 }
  0x2d   :  { %490 = vmatprep.subr.bf16.mxu1 %v792_v45 }
  0x2e   :  { %9 = vsyncpa [#allocation4], 0  ;;  %v800_v54 = vld [vmem:[%s1149_s2 + $0xc0] ss:$8 sps:$4 sm:$0xff]   ;;  %v802_v56 = vld [vmem:[%s1149_s2 + $0xd4] ss:$8 sps:$4 sm:$0xff]   ;;  %v628_v6 = vcombine.low %v27_v46, %v27_v46  ;;  %v630_v7 = vcombine.low %v28_v48, %v28_v48 }
  0x2f   :  { %450 = vmatpush1.bf16.msra.mxu0 %v794_v49  ;;  %v801_v55 = vld [vmem:[%s1149_s2 + $0x1c0] ss:$8 sps:$4 sm:$0xff]   ;;  %v804_v57 = vld [vmem:[%s1149_s2 + $0x1d4] ss:$8 sps:$4 sm:$0xff]   ;;  %v806_v58 = vld [vmem:[%s1149_s2 + $0xd0] ss:$8 sps:$4 sm:$0xff]  }
  0x30   :  { %491 = vmatpush1.bf16.msra.mxu1 %v795_v50  ;;  %451 = vmatprep.subr.bf16.mxu0 %v796_v52  ;;  %v807_v59 = vld [vmem:[%s1149_s2 + $0x1d0] ss:$8 sps:$4 sm:$0xff]   ;;  %v808_v60 = vld [vmem:[%s1149_s2 + $0xe4] ss:$8 sps:$4 sm:$0xff]   ;;  %v812_v62 = vld [vmem:[%s1149_s2 + $0xe0] ss:$8 sps:$4 sm:$0xff]  }
  0x31   :  { %492 = vmatprep.subr.bf16.mxu1 %v798_v53  ;;  %v810_v61 = vld [vmem:[%s1149_s2 + $0x1e4] ss:$8 sps:$4 sm:$0xff]   ;;  %v813_v63 = vld [vmem:[%s1149_s2 + $0x1e0] ss:$8 sps:$4 sm:$0xff]   ;;  %v814_v0 = vld [vmem:[%s1149_s2 + $0xf4] ss:$8 sps:$4 sm:$0xff]  }
  0x32   :  { %v816_v1 = vld [vmem:[%s1149_s2 + $0x1f4] ss:$8 sps:$4 sm:$0xff]   ;;  %v818_v2 = vld [vmem:[%s1149_s2 + $0xf0] ss:$8 sps:$4 sm:$0xff]   ;;  %v523_v4 = vld [vmem:[%s1150_s3] sm:$0xff]  ;;  %v848_v9 = vmov 0.0|0.0  }
  0x33   :  { %452 = vmatpush1.bf16.msra.mxu0 %v800_v54  ;;  %v819_v3 = vld [vmem:[%s1149_s2 + $0x1f0] ss:$8 sps:$4 sm:$0xff]   ;;  %v524_v5 = vld [vmem:[%s1150_s3 + $0x8] sm:$0xff]  ;;  %v527_v13 = vld [vmem:[%s1150_s3 + $0x20] sm:$0xff]  ;;  %vm23_vm0 = vcmask 64512   ;;  %v849_v19 = vmov 0.0  }
  0x34   :  { %493 = vmatpush1.bf16.msra.mxu1 %v801_v55  ;;  %453 = vmatprep.subr.bf16.mxu0 %v802_v56  ;;  %v698_v8 = vpack.c.bf16 %v524_v5, %v523_v4  ;;  %v525_v10 = vld [vmem:[%s1150_s3 + $0x10] sm:$0xff]  ;;  %v526_v11 = vld [vmem:[%s1150_s3 + $0x18] sm:$0xff]  ;;  %v528_v14 = vld [vmem:[%s1150_s3 + $0x28] sm:$0xff]  ;;  %24 = vst.msk [vmem:[#allocation2 + $0x8] sm:$0xff] %vm23_vm0, %v849_v19  ;;  %s850_s23 = smov [#allocation3]  }
  0x35   :  { %494 = vmatprep.subr.bf16.mxu1 %v804_v57  ;;  %v701_v12 = vpack.c.bf16 %v526_v11, %v525_v10  ;;  %v704_v15 = vpack.c.bf16 %v528_v14, %v527_v13  ;;  %v529_v16 = vld [vmem:[%s1150_s3 + $0x30] sm:$0xff]  ;;  %v530_v17 = vld [vmem:[%s1150_s3 + $0x38] sm:$0xff]  ;;  %v531_v20 = vld [vmem:[%s1150_s3 + $0x40] sm:$0xff]  ;;  %s620_s24 = sshll.u32 %s850_s23, 4  ;;  %s621_s24 = int_to_ptr.vmem [resolvable:$true] %s620_s24 }
  0x36   :  { %v707_v18 = vpack.c.bf16 %v530_v17, %v529_v16  ;;  %v532_v21 = vld [vmem:[%s1150_s3 + $0x48] sm:$0xff]  ;;  %v533_v23 = vld [vmem:[%s1150_s3 + $0x50] sm:$0xff]  ;;  %v534_v24 = vld [vmem:[%s1150_s3 + $0x58] sm:$0xff]  ;;  %s824_s25 = scalar_lea.vmem %s621_s24, 128  ;;  %p829_p1 = scmp.lt.s32.totalorder %s621_s24, %s621_s24 }
  0x37   :  { %454 = vmatpush1.bf16.msra.mxu0 %v806_v58  ;;  %v710_v22 = vpack.c.bf16 %v532_v21, %v531_v20  ;;  %v713_v25 = vpack.c.bf16 %v534_v24, %v533_v23  ;;  %v535_v26 = vld [vmem:[%s1150_s3 + $0x60] sm:$0xff]  ;;  %v536_v27 = vld [vmem:[%s1150_s3 + $0x68] sm:$0xff]  ;;  %v537_v29 = vld [vmem:[%s1150_s3 + $0x70] sm:$0xff]  ;;  %p825_p0 = scmp.ne.s32.totalorder %s621_s24, %s824_s25  ;;  %p830_p2 = scmp.lt.s32.totalorder %s824_s25, %s824_s25 }
  0x38   :  { %495 = vmatpush1.bf16.msra.mxu1 %v807_v59  ;;  %455 = vmatprep.subr.bf16.mxu0 %v808_v60  ;;  %v716_v28 = vpack.c.bf16 %v536_v27, %v535_v26  ;;  %v538_v30 = vld [vmem:[%s1150_s3 + $0x78] sm:$0xff]  ;;  %v539_v32 = vld [vmem:[%s1150_s3 + $0x80] sm:$0xff]  ;;  %v520_v45 = vld [vmem:[%s1148_s1 + $0x8] sm:$0xff] }
  0x39   :  { %496 = vmatprep.subr.bf16.mxu1 %v810_v61  ;;  %v719_v31 = vpack.c.bf16 %v538_v30, %v537_v29  ;;  %v519_v46 = vld [vmem:[%s1148_s1] sm:$0xff]  ;;  %p831_p3 = por %p830_p2, %p829_p1 }
  0x3b   :  { %456 = vmatpush1.bf16.msra.mxu0 %v812_v62  ;;  %v26_v38 = vld [vmem:[#allocation2 + $0x8] sm:$0xff]  ;;  %p832_p4 = pnand %p831_p3, %p825_p0 }
  0x3c   :  { %497 = vmatpush1.bf16.msra.mxu1 %v813_v63  ;;  %457 = vmatprep.subr.bf16.mxu0 %v814_v0 }
  0x3d   :  { %498 = vmatprep.subr.bf16.mxu1 %v816_v1 }
  0x3f   :  { %458 = vmatpush1.bf16.msra.mxu0 %v818_v2 }
  0x40   :  { %499 = vmatpush1.bf16.msra.mxu1 %v819_v3  ;;  %697 = vmatprep.subr.bf16.mxu0 %v848_v9 }
  0x42   :  { %460 = vmatmul.mubr.bf16.vlgmr.msra.gmra.mrb[0].mxu0 %v628_v6 }
  0x43   :  { %501 = vmatmul.mubr.bf16.vlgmr.msra.gmra.mrb[0].mxu1 %v630_v7  ;;  %699 = vmatpush1.bf16.msra.mxu0 %v698_v8 }
  0x44   :  { %700 = vmatprep.subr.bf16.mxu0 %v848_v9 }
  0x47   :  { %702 = vmatpush1.bf16.msra.mxu0 %v701_v12 }
  0x48   :  { %703 = vmatprep.subr.bf16.mxu0 %v848_v9 }
  0x4b   :  { %705 = vmatpush1.bf16.msra.mxu0 %v704_v15 }
  0x4c   :  { %706 = vmatprep.subr.bf16.mxu0 %v848_v9 }
  0x4f   :  { %708 = vmatpush1.bf16.msra.mxu0 %v707_v18 }
  0x50   :  { %709 = vmatprep.subr.bf16.mxu0 %v848_v9 }
  0x53   :  { %711 = vmatpush1.bf16.msra.mxu0 %v710_v22 }
  0x54   :  { %712 = vmatprep.subr.bf16.mxu0 %v848_v9 }
  0x57   :  { %714 = vmatpush1.bf16.msra.mxu0 %v713_v25 }
  0x58   :  { %715 = vmatprep.subr.bf16.mxu0 %v848_v9 }
  0x5b   :  { %717 = vmatpush1.bf16.msra.mxu0 %v716_v28 }
  0x5c   :  { %718 = vmatprep.subr.bf16.mxu0 %v848_v9 }
  0x5f   :  { %720 = vmatpush1.bf16.msra.mxu0 %v719_v31 }
  0x60   :  { %575 = vmatprep.subr.mxu0 %v849_v19 }
  0x63   :  { %576 = vmatpush1.msra.mxu0 %v539_v32 }
 0x115   :  { %v461_v33 = vpop.f32.mrb[0].mxu0 }
 0x116   :  { %v502_v34 = vpop.f32.mrb[0].mxu1  ;;  %v463_v36 = vpop.f32.mrb[1].mxu0 }
 0x117   :  { %v503_v35 = vadd.f32 %v502_v34, %v461_v33  ;;  %v504_v37 = vpop.f32.mrb[1].mxu1  ;;  %v465_v40 = vpop.f32.mrb[2].mxu0 }
 0x118   :  { %v505_v39 = vadd.f32 %v504_v37, %v463_v36  ;;  %v506_v41 = vpop.f32.mrb[2].mxu1  ;;  %v466_v42 = vpop.f32.mrb[3].mxu0 }
 0x119   :  { %v507_v43 = vpop.f32.mrb[3].mxu1  ;;  %v521_v49 = vmul.f32 %v519_v46, %v503_v35 }
 0x11a   :  { %v510_v44 = vadd.f32 %v505_v39, %v26_v38 }
 0x11c   :  { %513 = vst.msk [vmem:[#allocation2 + $0x8] sm:$0xff] %vm23_vm0, %v510_v44 }
 0x123   :  { %v518_v47 = vld [vmem:[#allocation2 + $0x8] sm:$0xff] }
 0x124   :  { %v522_v48 = vmul.f32 %v520_v45, %v518_v47 }
 0x126   :  { %696 = vmatprep.mubr.msk.f32.mxu0 %vm23_vm0, %v522_v48 }
 0x127   :  { %608 = vmatmul.mubr.f32.vlgmr.msra.gmra.mrb[4].mxu0 %v521_v49 }
 0x1fa   :  { %v609_v50 = vpop.f32.mrb[4].mxu0 }
 0x1fb   :  { %613 = vst.msk [vmem:[#allocation3] sm:$0xff] %vm23_vm0, %v609_v50  ;;  %v611_v51 = vpop.f32.mrb[5].mxu0 }
 0x1fc   :  { %835 = shalt.err (!%p832_p4)
}
 0x1fd   :  { %s836_s27 = scalar_lea.hbm %s1151_s4, 128 }
 0x1fe   :  { %p837_p5 = scmp.ne.s32.totalorder %s1151_s4, %s836_s27  ;;  %p840_p6 = scmp.lt.u32.totalorder %s836_s27, %s1151_s4 }
 0x200   :  { %p842_p7 = pnand %p840_p6, %p837_p5 }
 0x202   :  { %845 = shalt.err (!%p842_p7)
}
 0x203   :  { %623 = dma.vmem_to_hbm [thread:$0]  %s621_s24, 128, %s1151_s4, [#allocation4]  }
 0x204   :  { %846 = dma.done.wait [#allocation4], 128  }
 0x205   :  { %847 = vsyncadd [#allocation4], 4294967168 }
 0x206   :  { %627 = vsyncpa [#allocation4], 1 }

</bundles_post_ra>
